<compile_context>
chip_gen: v6e
topology: v6e:2x2x1
jax: 0.10.0
libtpu: 0.0.40
codegen_flags: <defaults>
</compile_context>

<pallas_src>
import numpy as np
import jax
import jax.numpy as jnp
from jax.experimental import pallas as pl
from jax.experimental.pallas import tpu as pltpu

ANCESTOR_INDEX = [
    [], [0], [0], [0], [0, 1], [0, 2], [0, 3], [0, 1, 4], [0, 2, 5], [0, 3, 6],
    [0, 1, 4, 7], [0, 2, 5, 8], [0, 3, 6, 9], [0, 3, 6, 9], [0, 3, 6, 9],
    [0, 3, 6, 9, 12], [0, 3, 6, 9, 13], [0, 3, 6, 9, 14], [0, 3, 6, 9, 13, 16],
    [0, 3, 6, 9, 14, 17], [0, 3, 6, 9, 13, 16, 18], [0, 3, 6, 9, 14, 17, 19],
    [0, 3, 6, 9, 13, 16, 18, 20], [0, 3, 6, 9, 14, 17, 19, 21],
]
NJOINT = len(ANCESTOR_INDEX)          # 24
NPOSE_PER_JOINT = 6
POSE_DIM = NJOINT * NPOSE_PER_JOINT   # 144
MIN_GDIM = NJOINT + NPOSE_PER_JOINT - 1  # 29: forward reads global_pose[..., :29]

# Conservative VMEM budget for the pipelined tiles (smallest default scoped
# limit across v5e/v6e/v7x is 16 MiB on v5e; leave headroom).
_VMEM_BUDGET_BYTES = 12 * 1024 * 1024


def _round_up(n, m):
    return ((n + m - 1) // m) * m


def ktd_kernel(x_ref, g_ref, wx_ref, wg_ref, b_ref, out_ref):
    """One row tile: out = x @ Wx + g @ Wg + b.

    x_ref  : (TN, H)        hidden features for TN rows
    g_ref  : (TN, G)        global pose for TN rows
    wx_ref : (H, 144)       collapsed tree weight for x (VMEM-resident)
    wg_ref : (G, 144)       collapsed tree weight for global_pose
    b_ref  : (1, 144)       collapsed bias
    out_ref: (TN, 144)
    """
    acc = jnp.dot(x_ref[...], wx_ref[...], preferred_element_type=jnp.float32)
    acc = acc + jnp.dot(g_ref[...], wg_ref[...],
                        preferred_element_type=jnp.float32)
    out_ref[...] = (acc + b_ref[...]).astype(out_ref.dtype)


def pack_params(weights, biases, hidden_dim, gdim):
    """Collapse the 24 per-joint Linear layers (torch layout W:(6,in), b:(6,))
    into pose = x @ Wx + global_pose @ Wg + b.

    Done in float64 by forward substitution: each joint's ancestors have
    strictly smaller indices, so their effective columns are already final
    when joint j is processed.
    """
    H = hidden_dim
    wx = np.zeros((H, POSE_DIM), np.float64)
    wg = np.zeros((gdim, POSE_DIM), np.float64)
    b = np.zeros((1, POSE_DIM), np.float64)
    for j, anc in enumerate(ANCESTOR_INDEX):
        wt = np.asarray(weights[j], dtype=np.float64).T  # (in_dim, 6)
        col = slice(NPOSE_PER_JOINT * j, NPOSE_PER_JOINT * (j + 1))
        # x part
        wx[:, col] += wt[:H]
        # global_pose[:, :, j:j+6] part
        off = H + NPOSE_PER_JOINT * len(anc)
        wg[j:j + NPOSE_PER_JOINT, col] += wt[off:off + NPOSE_PER_JOINT]
        # bias
        b[0, col] += np.asarray(biases[j], dtype=np.float64)
        # ancestor contributions: pose_a = x@Wx[:,a] + g@Wg[:,a] + b[:,a]
        for i, a in enumerate(anc):
            blk = wt[H + 6 * i:H + 6 * i + 6]  # (6, 6)
            acol = slice(NPOSE_PER_JOINT * a, NPOSE_PER_JOINT * (a + 1))
            wx[:, col] += wx[:, acol] @ blk
            wg[:, col] += wg[:, acol] @ blk
            b[:, col] += b[:, acol] @ blk
    return (jnp.asarray(wx, jnp.float32),
            jnp.asarray(wg, jnp.float32),
            jnp.asarray(b, jnp.float32))


def ktd_forward(x, global_pose, weights, biases, *, row_tile=1024,
                min_pallas_rows=1024, force_pallas=False,
                compute_dtype=jnp.float32):
    """x: (B, S, H), global_pose: (B, S, G>=29) -> (B, S, 144) f32.

    compute_dtype=jnp.bfloat16 halves input-side HBM traffic (f32 MXU accum is
    kept either way) at some precision cost; default is f32.
    """
    B, S, H = x.shape
    G = global_pose.shape[-1]
    assert G >= MIN_GDIM, "global_pose last dim must be >= 29"
    wx, wg, b = pack_params(weights, biases, H, G)

    N = B * S
    x2 = x.reshape(N, H).astype(compute_dtype)
    g2 = global_pose.reshape(N, G).astype(compute_dtype)
    wx = wx.astype(compute_dtype)
    wg = wg.astype(compute_dtype)

    # Small-N fast path: pallas_call / DMA setup overhead dominates tiny
    # problems; a plain (fusable) XLA dot is strictly cheaper.
    if (not force_pallas) and N < min_pallas_rows:
        out = (jnp.dot(x2, wx, preferred_element_type=jnp.float32)
               + jnp.dot(g2, wg, preferred_element_type=jnp.float32) + b)
        return out.reshape(B, S, POSE_DIM)

    # ---- Row-tile selection ----
    isz = jnp.dtype(compute_dtype).itemsize
    # Double-buffered per-row bytes (x + g tiles in compute dtype, out in f32)
    # plus double-buffered resident weights/bias.
    per_row = 2 * (H + G) * isz + 2 * POSE_DIM * 4
    weight_bytes = 2 * (H + G + 1) * POSE_DIM * isz
    tn_cap = max(8, ((_VMEM_BUDGET_BYTES - weight_bytes) // per_row) // 8 * 8)

    TN = min(_round_up(row_tile, 8), _round_up(N, 8), tn_cap)
    n_tiles = pl.cdiv(N, TN)
    # v7x megacore: avoid a 1-tile grid so both TensorCores get work.
    if n_tiles == 1 and N > 8:
        TN = _round_up(pl.cdiv(N, 2), 8)
        n_tiles = pl.cdiv(N, TN)

    out = pl.pallas_call(
        ktd_kernel,
        out_shape=jax.ShapeDtypeStruct((N, POSE_DIM), jnp.float32),
        grid_spec=pltpu.PrefetchScalarGridSpec(
            num_scalar_prefetch=0,
            grid=(n_tiles,),
            in_specs=[
                pl.BlockSpec((TN, H), lambda i: (i, 0)),
                pl.BlockSpec((TN, G), lambda i: (i, 0)),
                pl.BlockSpec((H, POSE_DIM), lambda i: (0, 0)),
                pl.BlockSpec((G, POSE_DIM), lambda i: (0, 0)),
                pl.BlockSpec((1, POSE_DIM), lambda i: (0, 0)),
            ],
            out_specs=pl.BlockSpec((TN, POSE_DIM), lambda i: (i, 0)),
        ),
        compiler_params=pltpu.CompilerParams(
            dimension_semantics=("parallel",),
        ),
    )(x2, g2, wx, wg, b)

    return out.reshape(B, S, POSE_DIM)


def ktd_reference(x, global_pose, weights, biases):
    """Direct JAX translation of the PyTorch forward (for verification)."""
    pose = []
    cnt = 0
    for j, anc in enumerate(ANCESTOR_INDEX):
        ances = jnp.concatenate(
            [x] + [pose[i] for i in anc] + [global_pose[:, :, cnt:cnt + 6]],
            axis=-1)
        cnt += 1
        pose.append(ances @ weights[j].T + biases[j])
    return jnp.concatenate(pose, axis=-1)


def _make_params(H, key):
    """Deterministic per-joint Linear params matching the __init__ shapes
    (xavier_uniform with gain=0.01, torch-default-style uniform bias)."""
    keys = jax.random.split(key, 2 * NJOINT)
    weights, biases = [], []
    for j, anc in enumerate(ANCESTOR_INDEX):
        in_dim = H + NPOSE_PER_JOINT * len(anc) + 6
        wb = 0.01 * np.sqrt(6.0 / (in_dim + NPOSE_PER_JOINT))
        bb = 1.0 / np.sqrt(in_dim)
        W = jax.random.uniform(keys[2 * j], (NPOSE_PER_JOINT, in_dim),
                               jnp.float32, -wb, wb)
        bvec = jax.random.uniform(keys[2 * j + 1], (NPOSE_PER_JOINT,),
                                  jnp.float32, -bb, bb)
        weights.append(W)
        biases.append(bvec)
    return weights, biases


if __name__ == "__main__":
    key = jax.random.PRNGKey(0)
    k_x, k_g, k_w, k_x2, k_g2 = jax.random.split(key, 5)

    # Small shapes consistent with the module: batch=2, seq=8, hidden=32.
    B, S, H = 2, 8, 32
    G = NJOINT * NPOSE_PER_JOINT  # 144; only [:, :, :29] is actually used
    x = jax.random.normal(k_x, (B, S, H), jnp.float32)
    global_pose = 0.1 * jax.random.normal(k_g, (B, S, G), jnp.float32)
    weights, biases = _make_params(H, k_w)

    # 1) Pallas path (forced, even though N is tiny) — exercises the kernel.
    out = ktd_forward(x, global_pose, weights, biases, force_pallas=True)
    out = jax.block_until_ready(out)
    ref = ktd_reference(x, global_pose, weights, biases)
    assert out.shape == (B, S, POSE_DIM)
    np.testing.assert_allclose(np.asarray(out), np.asarray(ref),
                               rtol=1e-3, atol=1e-4)

    # 2) Ragged-last-tile case (N=9 rows, TN=8 -> partial final block).
    B2, S2 = 1, 9
    x2 = jax.random.normal(k_x2, (B2, S2, H), jnp.float32)
    g2 = 0.1 * jax.random.normal(k_g2, (B2, S2, G), jnp.float32)
    out2 = ktd_forward(x2, g2, weights, biases, force_pallas=True)
    out2 = jax.block_until_ready(out2)
    ref2 = ktd_reference(x2, g2, weights, biases)
    np.testing.assert_allclose(np.asarray(out2), np.asarray(ref2),
                               rtol=1e-3, atol=1e-4)

    # 3) Small-N fast path (plain XLA dot) agrees too.
    out3 = ktd_forward(x, global_pose, weights, biases)  # N=16 < threshold
    out3 = jax.block_until_ready(out3)
    np.testing.assert_allclose(np.asarray(out3), np.asarray(ref),
                               rtol=1e-3, atol=1e-4)

    print("KERNEL_OK")
</pallas_src>

<mosaic_0001>
module attributes {stable_mosaic.version = 11 : i64} {
  func.func @ktd_kernel(%arg0: i32, %arg1: memref<8x32xf32, #tpu.memory_space<vmem>>, %arg2: memref<8x144xf32, #tpu.memory_space<vmem>>, %arg3: memref<32x144xf32, #tpu.memory_space<vmem>>, %arg4: memref<144x144xf32, #tpu.memory_space<vmem>>, %arg5: memref<1x144xf32, #tpu.memory_space<vmem>>, %arg6: memref<8x144xf32, #tpu.memory_space<vmem>>) attributes {dimension_semantics = [#tpu.dimension_semantics<parallel>], iteration_bounds = array<i64: 2>, scalar_prefetch = 0 : i64, scratch_operands = 0 : i64, tpu.core_type = #tpu.core_type<tc>, window_params = [{transform_indices = @transform_0, window_bounds = array<i64: 8, 32>}, {transform_indices = @transform_1, window_bounds = array<i64: 8, 144>}, {pipeline_mode = #tpu.pipeline_mode<synchronous>, transform_indices = @transform_2, window_bounds = array<i64: 32, 144>}, {pipeline_mode = #tpu.pipeline_mode<synchronous>, transform_indices = @transform_3, window_bounds = array<i64: 144, 144>}, {pipeline_mode = #tpu.pipeline_mode<synchronous>, transform_indices = @transform_4, window_bounds = array<i64: 1, 144>}, {transform_indices = @transform_5, window_bounds = array<i64: 8, 144>}]} {
    %c0 = arith.constant 0 : index
    %c0_0 = arith.constant 0 : index
    %0 = vector.load %arg1[%c0, %c0_0] : memref<8x32xf32, #tpu.memory_space<vmem>>, vector<8x32xf32>
    %c0_1 = arith.constant 0 : index
    %c0_2 = arith.constant 0 : index
    %1 = vector.load %arg3[%c0_1, %c0_2] : memref<32x144xf32, #tpu.memory_space<vmem>>, vector<32x144xf32>
    %cst = arith.constant dense<0.000000e+00> : vector<8x144xf32>
    %2 = tpu.matmul %0, %1, %cst {dimension_numbers = #tpu.dot_dimension_numbers<[1], [0], [0], [1], [0, 0, 1, 1], [], []>} : vector<8x32xf32>, vector<32x144xf32>, vector<8x144xf32> -> vector<8x144xf32>
    %c0_3 = arith.constant 0 : index
    %c0_4 = arith.constant 0 : index
    %3 = vector.load %arg2[%c0_3, %c0_4] : memref<8x144xf32, #tpu.memory_space<vmem>>, vector<8x144xf32>
    %c0_5 = arith.constant 0 : index
    %c0_6 = arith.constant 0 : index
    %4 = vector.load %arg4[%c0_5, %c0_6] : memref<144x144xf32, #tpu.memory_space<vmem>>, vector<144x144xf32>
    %cst_7 = arith.constant dense<0.000000e+00> : vector<8x144xf32>
    %5 = tpu.matmul %3, %4, %cst_7 {dimension_numbers = #tpu.dot_dimension_numbers<[1], [0], [0], [1], [0, 0, 1, 1], [], []>} : vector<8x144xf32>, vector<144x144xf32>, vector<8x144xf32> -> vector<8x144xf32>
    %6 = arith.addf %2, %5 : vector<8x144xf32>
    %c0_8 = arith.constant 0 : index
    %c0_9 = arith.constant 0 : index
    %7 = vector.load %arg5[%c0_8, %c0_9] : memref<1x144xf32, #tpu.memory_space<vmem>>, vector<1x144xf32>
    %8 = vector.broadcast %7 : vector<1x144xf32> to vector<8x144xf32>
    %9 = arith.addf %6, %8 : vector<8x144xf32>
    %c0_10 = arith.constant 0 : index
    %c0_11 = arith.constant 0 : index
    %10 = vector.load %arg6[%c0_10, %c0_11] : memref<8x144xf32, #tpu.memory_space<vmem>>, vector<8x144xf32>
    tpu.vector_store %arg6[%c0_10, %c0_11], %9 {strides = array<i32>} : memref<8x144xf32, #tpu.memory_space<vmem>>, vector<8x144xf32>,
    return
  }
  func.func @transform_0(%arg0: i32) -> (i32, i32) {
    %c0_i32 = arith.constant 0 : i32
    %c0_i32_0 = arith.constant 0 : i32
    return %arg0, %c0_i32 : i32, i32
  }
  func.func @transform_1(%arg0: i32) -> (i32, i32) {
    %c0_i32 = arith.constant 0 : i32
    %c0_i32_0 = arith.constant 0 : i32
    return %arg0, %c0_i32 : i32, i32
  }
  func.func @transform_2(%arg0: i32) -> (i32, i32) {
    %c0_i32 = arith.constant 0 : i32
    %c0_i32_0 = arith.constant 0 : i32
    %c0_i32_1 = arith.constant 0 : i32
    return %c0_i32, %c0_i32_0 : i32, i32
  }
  func.func @transform_3(%arg0: i32) -> (i32, i32) {
    %c0_i32 = arith.constant 0 : i32
    %c0_i32_0 = arith.constant 0 : i32
    %c0_i32_1 = arith.constant 0 : i32
    return %c0_i32, %c0_i32_0 : i32, i32
  }
  func.func @transform_4(%arg0: i32) -> (i32, i32) {
    %c0_i32 = arith.constant 0 : i32
    %c0_i32_0 = arith.constant 0 : i32
    %c0_i32_1 = arith.constant 0 : i32
    return %c0_i32, %c0_i32_0 : i32, i32
  }
  func.func @transform_5(%arg0: i32) -> (i32, i32) {
    %c0_i32 = arith.constant 0 : i32
    %c0_i32_0 = arith.constant 0 : i32
    return %arg0, %c0_i32 : i32, i32
  }
}

</mosaic_0001>

<bundles_post_ra>
// kernel: tpu_custom_call.1
= control target key start
LH: loop header
LB: loop body
LE: loop exit
PB: predicated region body
PF: predicated region fallthrough
CT: control target
= control target key end

     0   :  { %s1208_s0 = inlined_call_operand.hbm [shape: f32[16,32], index: 0, kind: input, shape index: {}]   ;;  %s1209_s1 = inlined_call_operand.hbm [shape: f32[16,144], index: 1, kind: input, shape index: {}]   ;;  %s1210_s2 = inlined_call_operand.hbm [shape: f32[32,144], index: 2, kind: input, shape index: {}]   ;;  %s1211_s3 = inlined_call_operand.hbm [shape: f32[144,144], index: 3, kind: input, shape index: {}]   ;;  %s1212_s4 = inlined_call_operand.vmem [shape: f32[1,144], index: 4, kind: input, shape index: {}]   ;;  %s1213_s5 = inlined_call_operand.hbm [shape: f32[16,144], index: 5, kind: output, shape index: {}]  }
   0x1   :  { %1218 = sst [smem:[#allocation16_spill]] %s1208_s0 }
   0x2   :  { %10 = vsyncpa [#allocation3], 0 }
   0x3   :  { %12 = vsyncpa [#allocation3 + $0x1], 0 }
   0x4   :  { %13 = vsyncpa [#allocation6], 0 }
   0x5   :  { %15 = vsyncpa [#allocation6 + $0x1], 0 }
   0x6   :  { %16 = vsyncpa [#allocation9], 0 }
   0x7   :  { %17 = vsyncpa [#allocation4], 0 }
   0x8   :  { %19 = vsyncpa [#allocation4 + $0x1], 0  ;;  %s971_s18 = smov 0   ;;  %s973_s19 = smov 0  }
   0x9   :  { %s975_s20 = smov 0   ;;  %s977_s21 = smov 0  }
   0xa LB: > { %s992_s22 = sadd.s32 4294967295, %s931_s21   ;;  %s647_s23 = sadd.s32 4294967294, %s931_s21   ;;  %s931_s21 = sphi %s977_s21, %s1240_s21   ;;  %s927_s20 = sphi %s975_s20, %s1239_s20   ;;  %s923_s19 = sphi %s973_s19, %s1238_s19   ;;  %s919_s18 = sphi %s971_s18, %s1237_s18  }
   0xb   : > { %p45_p0 = scmp.ne.s32.totalorder %s923_s19, %s919_s18  ;;  %p1214_p1 = scmp.eq.s32.totalorder %s992_s22, 0 }
   0xc   : > { %p164_p3 = scmp.eq.s32.totalorder %s647_s23, 1  ;;  %p648_p5 = scmp.ge.s32.totalorder %s931_s21, 1 }
   0xd   : > { %p1001_p4 = por %p1214_p1, %p45_p0  ;;  %p171_p7 = scmp.lt.s32.totalorder %s931_s21, 3 }
   0xe   : > { %p1006_p6 = por %p164_p3, %p45_p0  ;;  %s933_s27 = smov [#allocation7]  }
   0xf   : > { %s1219_s24 = scalar_select %p1001_p4, 1, 0 }
  0x10   : > { %s1220_s25 = scalar_select %p1006_p6, 1, 0 }
  0x11   : > { %p1011_p8 = pnand %p648_p5, %p171_p7  ;;  %s183_s28 = sshll.u32 %s933_s27, 4  ;;  %s184_s28 = int_to_ptr.vmem [resolvable:$true] %s183_s28 }
  0x12   : > { %s934_s30 = smov [#allocation8]   ;;  %s758_s7 = scalar_lea.vmem %s184_s28, 1024 }
  0x13   : > { %s1221_s26 = scalar_select %p1011_p8, 1, 0 }
  0x14   : > { %p686_p9 = pneg %p1011_p8  ;;  %s196_s6 = sshll.u32 %s934_s30, 4  ;;  %s197_s6 = int_to_ptr.vmem [resolvable:$true] %s196_s6 }
  0x15   : > { %p759_p13 = scmp.ne.s32.totalorder %s184_s28, %s758_s7  ;;  %p766_p5 = scmp.lt.s32.totalorder %s184_s28, %s184_s28 }
  0x16   : > { %p1020_p11 = pnand %p686_p9, %p1214_p1  ;;  %p767_p7 = scmp.lt.s32.totalorder %s758_s7, %s758_s7 }
  0x18   : > { %p749_p12 = pneg %p1020_p11  ;;  %p768_p10 = por %p767_p7, %p766_p5 }
  0x1a   : > { %p761_p0 = pnand %p759_p13, %p749_p12 }
  0x1c   : > { %p762_p3 = pneg %p761_p0 }
  0x1e   : > { %p769_p9 = pnand %p768_p10, %p762_p3 }
  0x20   : > { %772 = shalt.err (!%p769_p9)
}
  0x21   : > { %s935_s8 = smov 256   ;;  %s936_s9 = smov 16  }
  0x22   : > { %689 = dma.hbm_to_vmem [thread:$0]  (!%p1020_p11), %s1210_s2, 1024, %s184_s28, [#allocation6], %s935_s8, %s935_s8, %s936_s9  }
  0x23   : > { %s784_s12 = scalar_lea.vmem %s197_s6, 4608  ;;  %p792_p2 = scmp.lt.s32.totalorder %s197_s6, %s197_s6 }
  0x24   : > { %p785_p1 = scmp.ne.s32.totalorder %s197_s6, %s784_s12  ;;  %p793_p6 = scmp.lt.s32.totalorder %s784_s12, %s784_s12 }
  0x26   : > { %p787_p13 = pnand %p785_p1, %p749_p12  ;;  %p794_p5 = por %p793_p6, %p792_p2 }
  0x28   : > { %p788_p0 = pneg %p787_p13 }
  0x2a   : > { %p795_p10 = pnand %p794_p5, %p788_p0 }
  0x2c   : > { %798 = shalt.err (!%p795_p10)
}
  0x2d   : > { %692 = dma.hbm_to_vmem [thread:$0]  (!%p1020_p11), %s1211_s3, 4608, %s197_s6, [#allocation9], %s935_s8, %s935_s8, %s936_s9  }
  0x2e   : > { %s1043_s15 = sadd.s32 1, %s931_s21   ;;  %s32_s16 = sadd.s32 1, %s927_s20 }
  0x2f   : > { %s29_s17 = ssub.s32 %s931_s21, %s1043_s15  ;;  %p39_p1 = scmp.ne.s32.totalorder %s927_s20, %s923_s19 }
  0x30   : > { %p30_p2 = scmp.eq.s32.totalorder %s29_s17, 0  ;;  %p40_p6 = scmp.eq.s32.totalorder %s931_s21, 0 }
  0x31   : > { %p1223_p12 = scmp.eq.s32.totalorder %s992_s22, 1  ;;  %p706_p7 = scmp.lt.s32.totalorder %s931_s21, 2 }
  0x32   : > { %s1059_s27 = scalar_select %p30_p2, %s927_s20, %s32_s16  }
  0x33   : > { %p1053_p3 = por %p1223_p12, %p39_p1  ;;  %p41_p9 = por %p40_p6, %p39_p1 }
  0x34   : > { %s1062_s28 = sand.u32 1, %s927_s20   ;;  %s653_s30 = sshll.u32 %s931_s21, 7 }
  0x35   : > { %s1224_s23 = scalar_select %p1053_p3, 1, 0 }
  0x36   : > { %s652_s29 = sshll.u32 %s1062_s28, 3  ;;  %s1225_s0 = sld [smem:[#allocation16_spill]] }
  0x37   : > { %s217_s9 = scalar_lea.vmem [#allocation2], %s652_s29  ;;  %p1073_p11 = pnand %p706_p7, %p41_p9 }
  0x38   : > { %s224_s10 = sshll.u32 %s217_s9, 4  ;;  %s654_s13 = sshll.u32 %s1062_s28, 4  ;;  %s1071_s10 = int_to_ptr.vmem [resolvable:$true] %s224_s10 }
  0x39   : > { %s214_s14 = scalar_lea.sflag [#allocation3], %s1062_s28  ;;  %p801_p0 = pneg %p1073_p11 }
  0x3c   : > { %s1069_s8 = scalar_lea.hbm %s1225_s0, %s653_s30  ;;  %s804_s30 = scalar_lea.hbm %s1225_s0, 256 }
  0x3d   : > { %s799_s16 = scalar_lea.hbm %s1069_s8, 128  ;;  %p805_p1 = scmp.lt.s32.totalorder %s1069_s8, %s1225_s0 }
  0x3e   : > { %p800_p13 = scmp.ne.s32.totalorder %s1069_s8, %s799_s16  ;;  %p806_p2 = scmp.lt.s32.totalorder %s804_s30, %s799_s16 }
  0x40   : > { %p802_p5 = pnand %p801_p0, %p800_p13  ;;  %p807_p6 = por %p806_p2, %p805_p1 }
  0x42   : > { %p803_p10 = pneg %p802_p5 }
  0x44   : > { %p808_p12 = pnand %p807_p6, %p803_p10 }
  0x46   : > { %811 = shalt.err (!%p808_p12)
}
  0x47   : > { %s812_s9 = scalar_lea.vmem %s1071_s10, 128  ;;  %s937_s17 = smov [#allocation2]  }
  0x48   : > { %p813_p7 = scmp.ne.s32.totalorder %s1071_s10, %s812_s9  ;;  %s817_s29 = sshll.u32 %s937_s17, 4  ;;  %s818_s29 = int_to_ptr.vmem [resolvable:$false] %s817_s29 }
  0x49   : > { %s819_s12 = scalar_lea.vmem %s818_s29, 256  ;;  %p820_p5 = scmp.lt.s32.totalorder %s1071_s10, %s818_s29 }
  0x4a   : > { %p815_p9 = pnand %p813_p7, %p801_p0  ;;  %p821_p3 = scmp.lt.s32.totalorder %s819_s12, %s812_s9 }
  0x4c   : > { %p816_p13 = pneg %p815_p9  ;;  %p822_p4 = por %p821_p3, %p820_p5 }
  0x4e   : > { %p823_p1 = pnand %p822_p4, %p816_p13 }
  0x50   : > { %826 = shalt.err (!%p823_p1)
}
  0x51   : > { %696 = dma.hbm_to_vmem [thread:$0]  (!%p1073_p11), %s1069_s8, 128, %s1071_s10, %s214_s14  }
  0x52   : > { %s670_s16 = sshll.u32 %s931_s21, 8  ;;  %s235_s12 = scalar_lea.vmem [#allocation5], %s654_s13 }
  0x53   : > { %s1108_s7 = scalar_lea.hbm %s1209_s1, %s670_s16  ;;  %s243_s9 = sshll.u32 %s235_s12, 4  ;;  %s244_s9 = int_to_ptr.vmem [resolvable:$true] %s243_s9 }
  0x54   : > { %s1227_s17 = sand.u32 1, %s931_s21   ;;  %s827_s0 = scalar_lea.hbm %s1108_s7, 256 }
  0x55   : > { %s232_s29 = scalar_lea.sflag [#allocation6], %s1227_s17  ;;  %p828_p4 = scmp.ne.s32.totalorder %s1108_s7, %s827_s0 }
  0x56   : > { %s832_s14 = scalar_lea.hbm %s1209_s1, 512  ;;  %p833_p2 = scmp.lt.s32.totalorder %s1108_s7, %s1209_s1 }
  0x57   : > { %p830_p3 = pnand %p828_p4, %p801_p0  ;;  %p834_p6 = scmp.lt.s32.totalorder %s832_s14, %s827_s0 }
  0x59   : > { %p831_p10 = pneg %p830_p3  ;;  %p835_p12 = por %p834_p6, %p833_p2 }
  0x5b   : > { %p836_p7 = pnand %p835_p12, %p831_p10 }
  0x5d   : > { %839 = shalt.err (!%p836_p7)
}
  0x5e   : > { %s840_s13 = scalar_lea.vmem %s244_s9, 256  ;;  %s938_s30 = smov [#allocation5]  }
  0x5f   : > { %p841_p9 = scmp.ne.s32.totalorder %s244_s9, %s840_s13  ;;  %s845_s6 = sshll.u32 %s938_s30, 4  ;;  %s846_s6 = int_to_ptr.vmem [resolvable:$false] %s845_s6 }
  0x60   : > { %s847_s12 = scalar_lea.vmem %s846_s6, 512  ;;  %p848_p1 = scmp.lt.s32.totalorder %s244_s9, %s846_s6 }
  0x61   : > { %p843_p13 = pnand %p841_p9, %p801_p0  ;;  %p849_p4 = scmp.lt.s32.totalorder %s847_s12, %s840_s13 }
  0x63   : > { %p844_p5 = pneg %p843_p13  ;;  %p850_p3 = por %p849_p4, %p848_p1 }
  0x65   : > { %p851_p8 = pnand %p850_p3, %p844_p5 }
  0x67   : > { %854 = shalt.err (!%p851_p8)
}
  0x68   : > { %699 = dma.hbm_to_vmem [thread:$0]  (!%p1073_p11), %s1108_s7, 256, %s244_s9, %s232_s29  }
  0x69   : > { %p1228_p10 = scmp.ne.s32.totalorder %s1221_s26, 0 }
  0x6a   : > { %s1135_s0 = sand.u32 (!%p1228_p10), 1, %s923_s19   ;;  %p1229_p0 = scmp.ne.s32.totalorder (!%p1228_p10), %s1219_s24, 0 }
  0x6b   : > { %252 = sbr.rel (%p1228_p10) target bundleno = 371 (0x173), region = 40  ;;  %s658_s17 = sshll.u32 (!%p1228_p10), %s1135_s0, 3 }
  0x6c   : > { %s255_s8 = scalar_lea.sflag (!%p1228_p10), [#allocation3], %s1135_s0  ;;  %s1139_s10 = scalar_lea.vmem (!%p1228_p10), [#allocation2], %s658_s17 }
  0x70   : > { %898 = dma.done.wait (%p1229_p0), %s255_s8, 128  }
  0x71   : > { %900 = vsyncadd (%p1229_p0), %s255_s8, 4294967168  ;;  %s263_s26 = sand.u32 1, %s992_s22   ;;  %s659_s11 = sshll.u32 %s1135_s0, 4 }
  0x72   : > { %s264_s7 = scalar_lea.sflag [#allocation6], %s263_s26  ;;  %s1149_s9 = scalar_lea.vmem [#allocation5], %s659_s11 }
  0x73   : > { %902 = dma.done.wait (%p1229_p0), %s264_s7, 256  }
  0x74   : > { %904 = vsyncadd (%p1229_p0), %s264_s7, 4294967040  ;;  %p1230_p8 = scmp.eq.s32.totalorder %s992_s22, 0 }
  0x76   : > { %906 = dma.done.wait (%p1230_p8), [#allocation6], 1024   ;;  %p1231_p11 = pmov %p1230_p8 }
  0x77   : > { %p1232_p2 = pmov %p1230_p8 }
  0x78   : > { %908 = vsyncadd (%p1231_p11), [#allocation6], 4294966272 }
  0x79   : > { %910 = dma.done.wait (%p1232_p2), [#allocation9], 4608   ;;  %p1233_p6 = pmov %p1232_p2 }
  0x7a   : > { %v939_v0 = vmov 0.0   ;;  %v349_v1 = vld [vmem:[#allocation8 + $0xf8] sm:$0xff]  ;;  %v348_v2 = vld [vmem:[#allocation8 + $0xf0] sm:$0xff]  ;;  %v347_v3 = vld [vmem:[#allocation8 + $0xe8] sm:$0xff]  ;;  %vm429_vm0 = vcmask 261120   ;;  %vm354_vm1 = vcmask 130048   ;;  %v506_v48 = vlaneseq }
  0x7b   : > { %912 = vsyncadd (%p1233_p6), [#allocation9], 4294962688  ;;  %497 = vmatprep.mubr.f32.mxu1 %v939_v0  ;;  %358 = vmatprep.subr.mxu0 %v349_v1  ;;  %v346_v4 = vld [vmem:[#allocation8 + $0xe0] sm:$0xff]  ;;  %v345_v5 = vld [vmem:[#allocation8 + $0xd8] sm:$0xff]  ;;  %s671_s14 = sshll.u32 %s992_s22, 8  ;;  %s306_s16 = scalar_lea.vmem [#allocation10], %s659_s11 }
  0x7c   : > { %359 = vmatpush1.msra.mxu0 %v348_v2  ;;  %v344_v6 = vld [vmem:[#allocation8 + $0xd0] sm:$0xff]  ;;  %v343_v7 = vld [vmem:[#allocation8 + $0xc8] sm:$0xff]  ;;  %v342_v8 = vld [vmem:[#allocation8 + $0xc0] sm:$0xff]  ;;  %v507_v49 = vshrl.u32 %v506_v48, 7  ;;  %s535_s28 = sshll.u32 %s306_s16, 4  ;;  %s533_s6 = scalar_lea.hbm %s1213_s5, %s671_s14  ;;  %s536_s28 = int_to_ptr.vmem [resolvable:$true] %s535_s28 }
  0x7d   : > { %360 = vmatprep.subr.mxu0 %v347_v3  ;;  %v341_v9 = vld [vmem:[#allocation8 + $0xb8] sm:$0xff]  ;;  %v340_v10 = vld [vmem:[#allocation8 + $0xb0] sm:$0xff]  ;;  %v339_v11 = vld [vmem:[#allocation8 + $0xa8] sm:$0xff]  ;;  %s521_s12 = scalar_lea.sflag [#allocation4], %s1135_s0  ;;  %s855_s17 = scalar_lea.vmem %s536_s28, 256 }
  0x7e   : > { %361 = vmatpush1.msra.mxu0 %v346_v4  ;;  %v338_v12 = vld [vmem:[#allocation8 + $0xa0] sm:$0xff]  ;;  %v315_v13 = vld [vmem:[#allocation7 + $0x38] sm:$0xff]  ;;  %v314_v14 = vld [vmem:[#allocation7 + $0x30] sm:$0xff]  ;;  %v508_v50 = vsub.s32 0, %v507_v49  ;;  %v512_v52 = vsub.s32 1, %v507_v49  ;;  %p856_p12 = scmp.ne.s32.totalorder %s536_s28, %s855_s17  ;;  %p1234_p7 = scmp.ne.s32.totalorder %s1224_s23, 0 }
  0x7f   : > { %362 = vmatprep.subr.mxu0 %v345_v5  ;;  %v337_v15 = vld [vmem:[#allocation8 + $0x98] sm:$0xff]  ;;  %457 = vmatprep.subr.mxu1 %v315_v13  ;;  %v313_v16 = vld [vmem:[#allocation7 + $0x28] sm:$0xff]  ;;  %v336_v17 = vld [vmem:[#allocation8 + $0x90] sm:$0xff]  ;;  %s940_s22 = smov [#allocation10]  }
  0x80   : > { %363 = vmatpush1.msra.mxu0 %v344_v6  ;;  %458 = vmatpush1.msra.mxu1 %v314_v14  ;;  %v312_v18 = vld [vmem:[#allocation7 + $0x20] sm:$0xff]  ;;  %v311_v19 = vld [vmem:[#allocation7 + $0x18] sm:$0xff]  ;;  %v335_v20 = vld [vmem:[#allocation8 + $0x88] sm:$0xff]  ;;  %p857_p9 = pnand %p856_p12, %p1234_p7  ;;  %s859_s8 = sshll.u32 %s940_s22, 4  ;;  %s860_s8 = int_to_ptr.vmem [resolvable:$false] %s859_s8 }
  0x81   : > { %364 = vmatprep.subr.mxu0 %v343_v7  ;;  %459 = vmatprep.subr.mxu1 %v313_v16  ;;  %v310_v21 = vld [vmem:[#allocation7 + $0x10] sm:$0xff]  ;;  %v334_v22 = vld [vmem:[#allocation8 + $0x80] sm:$0xff]  ;;  %v309_v23 = vld [vmem:[#allocation7 + $0x8] sm:$0xff]  ;;  %p862_p5 = scmp.lt.s32.totalorder %s536_s28, %s860_s8 }
  0x82   : > { %365 = vmatpush1.msra.mxu0 %v342_v8  ;;  %460 = vmatpush1.msra.mxu1 %v312_v18  ;;  %v333_v24 = vld [vmem:[#allocation8 + $0x78] sm:$0xff]  ;;  %v308_v25 = vld [vmem:[#allocation7] sm:$0xff]  ;;  %v332_v26 = vld [vmem:[#allocation8 + $0x70] sm:$0xff]  ;;  %p858_p13 = pneg %p857_p9 }
  0x83   : > { %366 = vmatprep.subr.mxu0 %v341_v9  ;;  %461 = vmatprep.subr.mxu1 %v311_v19  ;;  %v307_v27 = vld [vmem:[%s1139_s10] sm:$0xff]  ;;  %v331_v28 = vld [vmem:[#allocation8 + $0x68] sm:$0xff]  ;;  %v330_v30 = vld [vmem:[#allocation8 + $0x60] sm:$0xff]  ;;  %s861_s10 = scalar_lea.vmem %s860_s8, 512 }
  0x84   : > { %367 = vmatpush1.msra.mxu0 %v340_v10  ;;  %462 = vmatpush1.msra.mxu1 %v310_v21  ;;  %v317_v29 = vld [vmem:[%s1149_s9 + $0x8] sm:$0xff]  ;;  %v328_v32 = vld [vmem:[#allocation8 + $0x50] sm:$0xff]  ;;  %v326_v34 = vld [vmem:[#allocation8 + $0x40] sm:$0xff]  ;;  %p863_p1 = scmp.lt.s32.totalorder %s861_s10, %s855_s17 }
  0x85   : > { %368 = vmatprep.subr.mxu0 %v339_v11  ;;  %463 = vmatprep.subr.mxu1 %v309_v23  ;;  %v329_v31 = vld [vmem:[#allocation8 + $0x58] sm:$0xff]  ;;  %v327_v33 = vld [vmem:[#allocation8 + $0x48] sm:$0xff]  ;;  %v324_v36 = vld [vmem:[#allocation8 + $0x30] sm:$0xff] }
  0x86   : > { %369 = vmatpush1.msra.mxu0 %v338_v12  ;;  %464 = vmatpush1.msra.mxu1 %v308_v25  ;;  %v325_v35 = vld [vmem:[#allocation8 + $0x38] sm:$0xff]  ;;  %v323_v37 = vld [vmem:[#allocation8 + $0x28] sm:$0xff]  ;;  %v322_v38 = vld [vmem:[#allocation8 + $0x20] sm:$0xff]  ;;  %p864_p4 = por %p863_p1, %p862_p5 }
  0x87   : > { %370 = vmatprep.subr.mxu0 %v337_v15  ;;  %664 = vmatmul.mubr.msk.f32.vlgmr.msra.gmra.mxu1 %vm429_vm0, %v307_v27  ;;  %v321_v39 = vld [vmem:[#allocation8 + $0x18] sm:$0xff]  ;;  %v320_v40 = vld [vmem:[#allocation8 + $0x10] sm:$0xff]  ;;  %v319_v41 = vld [vmem:[#allocation8 + $0x8] sm:$0xff] }
  0x88   : > { %371 = vmatpush1.msra.mxu0 %v336_v17  ;;  %663 = vmatprep.mubr.msk.f32.mxu0 %vm354_vm1, %v317_v29  ;;  %v318_v42 = vld [vmem:[#allocation8] sm:$0xff]  ;;  %v353_v43 = vld [vmem:[#allocation8 + $0x118] sm:$0xff]  ;;  %v352_v44 = vld [vmem:[#allocation8 + $0x110] sm:$0xff]  ;;  %p865_p3 = pnand %p864_p4, %p858_p13 }
  0x89   : > { %372 = vmatprep.subr.mxu0 %v335_v20  ;;  %v351_v45 = vld [vmem:[#allocation8 + $0x108] sm:$0xff]  ;;  %v350_v46 = vld [vmem:[#allocation8 + $0x100] sm:$0xff]  ;;  %v504_v51 = vld [vmem:[%s1212_s4] sm:$0x3] }
  0x8a   : > { %373 = vmatpush1.msra.mxu0 %v334_v22  ;;  %v316_v47 = vld [vmem:[%s1149_s9] sm:$0xff]  ;;  %v509_v54 = vrot.slane %v504_v51, %v508_v50  ;;  %v513_v57 = vrot.slane %v504_v51, %v512_v52 }
  0x8b   : > { %374 = vmatprep.subr.mxu0 %v333_v24 }
  0x8c   : > { %375 = vmatpush1.msra.mxu0 %v332_v26 }
  0x8d   : > { %376 = vmatprep.subr.mxu0 %v331_v28 }
  0x8e   : > { %377 = vmatpush1.msra.mxu0 %v330_v30 }
  0x8f   : > { %378 = vmatprep.subr.mxu0 %v329_v31 }
  0x90   : > { %379 = vmatpush1.msra.mxu0 %v328_v32 }
  0x91   : > { %380 = vmatprep.subr.mxu0 %v327_v33 }
  0x92   : > { %381 = vmatpush1.msra.mxu0 %v326_v34 }
  0x93   : > { %382 = vmatprep.subr.mxu0 %v325_v35 }
  0x94   : > { %383 = vmatpush1.msra.mxu0 %v324_v36 }
  0x95   : > { %384 = vmatprep.subr.mxu0 %v323_v37 }
  0x96   : > { %385 = vmatpush1.msra.mxu0 %v322_v38 }
  0x97   : > { %386 = vmatprep.subr.mxu0 %v321_v39 }
  0x98   : > { %387 = vmatpush1.msra.mxu0 %v320_v40 }
  0x99   : > { %388 = vmatprep.subr.mxu0 %v319_v41 }
  0x9a   : > { %389 = vmatpush1.msra.mxu0 %v318_v42 }
  0x9b   : > { %418 = vmatprep.subr.mxu0 %v353_v43 }
  0x9c   : > { %419 = vmatpush2.msra.mxu0 %v352_v44 }
  0x9d   : > { %420 = vmatprep.subr.mxu0 %v351_v45 }
  0x9e   : > { %421 = vmatpush2.msra.mxu0 %v350_v46 }
  0x9f   : > { %423 = vmatmul.mubr.f32.vlgmr.msra.gmra.mxu0 %v316_v47 }
 0x147   : > { %v499_v53 = vpop.f32.mrf.mxu1 }
 0x149   : > { %v501_v58 = vpop.f32.mrf.mxu1 }
 0x15f   : > { %v424_v55 = vpop.f32.mrf.mxu0 }
 0x160   : > { %v500_v56 = vadd.f32 %v499_v53, %v424_v55 }
 0x161   : > { %v426_v59 = vpop.f32.mrf.mxu0 }
 0x162   : > { %v516_v60 = vadd.f32 %v509_v54, %v500_v56  ;;  %v502_v61 = vadd.f32 %v501_v58, %v426_v59 }
 0x164   : > { %518 = vst [vmem:[%s306_s16] sm:$0xff] %v516_v60  ;;  %v517_v62 = vadd.f32 %v513_v57, %v502_v61 }
 0x166   : > { %519 = vst.msk [vmem:[%s306_s16 + $0x8] sm:$0xff] %vm354_vm1, %v517_v62 }
 0x167   : > { %868 = shalt.err (!%p865_p3)
}
 0x168   : > { %s869_s26 = scalar_lea.hbm %s533_s6, 256  ;;  %s873_s7 = scalar_lea.hbm %s1213_s5, 512 }
 0x169   : > { %p870_p10 = scmp.ne.s32.totalorder %s533_s6, %s869_s26  ;;  %p874_p11 = scmp.lt.s32.totalorder %s533_s6, %s1213_s5 }
 0x16a   : > { %p875_p2 = scmp.lt.s32.totalorder %s873_s7, %s869_s26 }
 0x16b   : > { %p871_p0 = pnand %p870_p10, %p1234_p7 }
 0x16c   : > { %p876_p6 = por %p875_p2, %p874_p11 }
 0x16d   : > { %p872_p8 = pneg %p871_p0 }
 0x16f   : > { %p877_p12 = pnand %p876_p6, %p872_p8 }
 0x171   : > { %880 = shalt.err (!%p877_p12)
}
 0x172   : > { %684 = dma.vmem_to_hbm [thread:$0]  (%p1234_p7), %s536_s28, 256, %s533_s6, %s521_s12  }
 0x173 PF: > { %s547_s29 = sand.u32 1, %s919_s18   ;;  %p1235_p9 = scmp.ne.s32.totalorder %s1220_s25, 0 }
 0x174   : > { %p1236_p13 = scmp.ge.s32.totalorder %s931_s21, 2  ;;  %s548_s14 = scalar_lea.sflag [#allocation4], %s547_s29 }
 0x176   : > { %p701_p5 = pnand %p1236_p13, %p1235_p9 }
 0x178   : > { %p702_p1 = pneg %p701_p5 }
 0x17a   : > { %914 = dma.done.wait (%p702_p1), %s548_s14, 256  }
 0x17b   : > { %916 = vsyncadd (%p702_p1), %s548_s14, 4294967040  ;;  %p22_p4 = scmp.ge.s32.totalorder %s1043_s15, 4   ;;  %s1237_s18 = smov %s923_s19 }
 0x17c   : > { %s1238_s19 = smov %s927_s20  ;;  %s1239_s20 = smov %s1059_s27 }
 0x17d   : > { %s1240_s21 = smov %s1043_s15  ;;  %24 = sbr.rel (!%p22_p4) target bundleno = 10 (0xa), region = 106 }
 0x182   :  { %553 = vsyncpa [#allocation3], 1 }
 0x183   :  { %555 = vsyncpa [#allocation3 + $0x1], 1 }
 0x184   :  { %556 = vsyncpa [#allocation6], 1 }
 0x185   :  { %558 = vsyncpa [#allocation6 + $0x1], 1 }
 0x186   :  { %559 = vsyncpa [#allocation9], 1 }
 0x187   :  { %560 = vsyncpa [#allocation4], 1 }
 0x188   :  { %562 = vsyncpa [#allocation4 + $0x1], 1 }

</bundles_post_ra>
